<compile_context>
chip_gen: v7x
topology: tpu7x:2x2x1
jax: 0.10.0
libtpu: 0.0.40
codegen_flags: <defaults>
</compile_context>

<pallas_src>
import jax
import jax.numpy as jnp
from jax.experimental import pallas as pl
from jax.experimental.pallas import tpu as pltpu

_NEG = jnp.float32(-1e30)  # bias for padded logit columns -> exp underflows to exactly 0


def _round_up(n, m):
    return ((n + m - 1) // m) * m


def _softmax_store(logits, o_ref):
    # numerically stable softmax over the (padded, lane-dense) last axis, all in f32;
    # exact division so each row's probabilities sum to 1 (downstream sampling / log-probs).
    m = jnp.max(logits, axis=-1, keepdims=True)
    e = jnp.exp(logits - m)
    denom = jnp.sum(e, axis=-1, keepdims=True)
    probs = e / denom
    # compact store: only the real OUT columns (padded columns are exactly 0 anyway)
    o_ref[...] = probs[:, : o_ref.shape[-1]].astype(o_ref.dtype)


def nn_policy_ml_kernel(x_ref, w1_ref, b1_ref, w2_ref, b2_ref, o_ref):
    # x arrives f32; cast to bf16 in VMEM (VPU) right before the MXU matmul
    x = x_ref[...].astype(jnp.bfloat16)
    # layer 1: bf16 x bf16 on the MXU, f32 accumulate; bias + ReLU in f32
    h = jnp.dot(x, w1_ref[...], preferred_element_type=jnp.float32)
    h = jnp.maximum(h + b1_ref[...], 0.0)
    # layer 2: back to bf16 for the MXU, f32 accumulate; padded columns carry -1e30 bias
    logits = jnp.dot(h.astype(jnp.bfloat16), w2_ref[...],
                     preferred_element_type=jnp.float32) + b2_ref[...]
    _softmax_store(logits, o_ref)


def nn_policy_sl_kernel(x_ref, w1_ref, b1_ref, o_ref):
    # single-layer policy: Linear -> Softmax (no ReLU, no second matmul)
    x = x_ref[...].astype(jnp.bfloat16)
    logits = jnp.dot(x, w1_ref[...], preferred_element_type=jnp.float32) + b1_ref[...]
    _softmax_store(logits, o_ref)


def prepare_params(w1, b1, w2=None, b2=None):
    """One-time weight preparation, hoisted out of the hot forward path.

    Casts weights to bf16 and pads the final projection to a 128-multiple lane width;
    padded columns get zero weights and a -1e30 bias so softmax over the padded width
    equals softmax over the real OUT columns exactly.
    Returns (params_tuple, OUT).
    """
    is_multilayer = w2 is not None
    IN, H = w1.shape
    OUT = w2.shape[1] if is_multilayer else H
    out_pad = _round_up(max(OUT, 128), 128)

    if is_multilayer:
        w1c = w1.astype(jnp.bfloat16)
        b1c = b1.reshape(1, -1).astype(jnp.float32)
        w2p = jnp.zeros((H, out_pad), jnp.bfloat16).at[:, :OUT].set(w2.astype(jnp.bfloat16))
        b2p = jnp.full((1, out_pad), _NEG, jnp.float32).at[:, :OUT].set(
            b2.reshape(1, -1).astype(jnp.float32))
        return (w1c, b1c, w2p, b2p), OUT
    else:
        w1p = jnp.zeros((IN, out_pad), jnp.bfloat16).at[:, :OUT].set(w1.astype(jnp.bfloat16))
        b1p = jnp.full((1, out_pad), _NEG, jnp.float32).at[:, :OUT].set(
            b1.reshape(1, -1).astype(jnp.float32))
        return (w1p, b1p), OUT


def _choose_tiles(B, tile_b):
    """Pick (B_pad, tile, n_tiles) for the batch grid."""
    tile_b = max(_round_up(tile_b, 8), 8)
    B_min = _round_up(max(B, 1), 8)          # minimal sublane-aligned batch
    if B_min <= tile_b:
        if B_min >= 256:
            # enough work: exactly 2 tiles so both v7x TensorCores get one
            # (dimension_semantics=("parallel",)); extra step is ~0.35 us on v5e/v6e.
            half = _round_up((B_min + 1) // 2, 8)
            return 2 * half, half, 2
        # latency path (e.g. single-observation action sampling): one minimal tile
        return B_min, B_min, 1
    B_pad = _round_up(B, tile_b)
    return B_pad, tile_b, B_pad // tile_b


def nn_policy_forward_prepared(x, prepared, *, tile_b=2048):
    """Hot-path fused forward. `prepared` comes from prepare_params().

    x: (B, IN) float32 (cast to bf16 inside the kernel).
    Returns action probabilities (B, OUT), float32, rows summing to 1.

    tile_b: max batch tile. Even at tile_b=2048 the double-buffered f32 x tile plus the
    compact f32 out tile is <2.5 MiB VMEM, far under v7x's 64 MiB (and v5e/v6e's 128 MiB),
    so there is no generation-specific tiling hazard; v5e only needs 8-row alignment.
    """
    params, OUT = prepared
    is_multilayer = len(params) == 4
    B, IN = x.shape

    B_pad, tile, n_tiles = _choose_tiles(B, tile_b)
    xp = x if x.dtype == jnp.float32 else x.astype(jnp.float32)
    if B_pad != B:
        xp = jnp.pad(xp, ((0, B_pad - B), (0, 0)))

    row = lambda i: (i, 0)      # x / out stream over the batch grid
    const = lambda i: (0, 0)    # weights & biases stay resident in VMEM

    compiler_params = pltpu.CompilerParams(
        dimension_semantics=("parallel",),    # megacore-shard the batch axis on v7x
        vmem_limit_bytes=32 * 1024 * 1024,    # huge headroom; kernel uses ~2-3 MiB
    )
    # NOTE: output DMA is now ~16x smaller than before (compact OUT columns); if a profile
    # ever shows exposed output writeback, add pipeline_mode=pl.Buffered(3) to out_specs only.

    if is_multilayer:
        w1c, b1c, w2p, b2p = params
        out = pl.pallas_call(
            nn_policy_ml_kernel,
            out_shape=jax.ShapeDtypeStruct((B_pad, OUT), jnp.float32),
            grid=(n_tiles,),
            in_specs=[
                pl.BlockSpec((tile, IN), row),
                pl.BlockSpec(w1c.shape, const),
                pl.BlockSpec(b1c.shape, const),
                pl.BlockSpec(w2p.shape, const),
                pl.BlockSpec(b2p.shape, const),
            ],
            out_specs=pl.BlockSpec((tile, OUT), row),
            compiler_params=compiler_params,
        )(xp, w1c, b1c, w2p, b2p)
    else:
        w1p, b1p = params
        out = pl.pallas_call(
            nn_policy_sl_kernel,
            out_shape=jax.ShapeDtypeStruct((B_pad, OUT), jnp.float32),
            grid=(n_tiles,),
            in_specs=[
                pl.BlockSpec((tile, IN), row),
                pl.BlockSpec(w1p.shape, const),
                pl.BlockSpec(b1p.shape, const),
            ],
            out_specs=pl.BlockSpec((tile, OUT), row),
            compiler_params=compiler_params,
        )(xp, w1p, b1p)

    return out if B_pad == B else out[:B]


def nn_policy_forward(x, w1, b1, w2=None, b2=None, *, tile_b=2048):
    """Convenience wrapper: per-call weight prep + forward.
    For repeated calls (the RL hot path), call prepare_params() once and reuse
    nn_policy_forward_prepared()."""
    return nn_policy_forward_prepared(x, prepare_params(w1, b1, w2, b2), tile_b=tile_b)


def init_params(key, input_size, output_size, is_multilayer=True, num_hidden=128):
    """nn.Linear-style U(-1/sqrt(fan_in), 1/sqrt(fan_in)) init; weights stored as (in, out).
    Single-layer policy returns (w1, b1, None, None)."""
    if not is_multilayer:
        num_hidden = output_size
    k1, k2, k3, k4 = jax.random.split(key, 4)
    bound1 = 1.0 / jnp.sqrt(jnp.float32(input_size))
    w1 = jax.random.uniform(k1, (input_size, num_hidden), jnp.float32, -bound1, bound1)
    b1 = jax.random.uniform(k2, (1, num_hidden), jnp.float32, -bound1, bound1)
    if not is_multilayer:
        return w1, b1, None, None
    bound2 = 1.0 / jnp.sqrt(jnp.float32(num_hidden))
    w2 = jax.random.uniform(k3, (num_hidden, output_size), jnp.float32, -bound2, bound2)
    b2 = jax.random.uniform(k4, (1, output_size), jnp.float32, -bound2, bound2)
    return w1, b1, w2, b2


def nn_policy_ref(x, w1, b1, w2=None, b2=None):
    """Pure-JAX reference mirroring the kernel's mixed precision (bf16 matmuls, f32 rest)."""
    logits = jnp.dot(x.astype(jnp.bfloat16), w1.astype(jnp.bfloat16),
                     preferred_element_type=jnp.float32) + b1.reshape(1, -1).astype(jnp.float32)
    if w2 is not None:
        h = jnp.maximum(logits, 0.0).astype(jnp.bfloat16)
        logits = jnp.dot(h, w2.astype(jnp.bfloat16),
                         preferred_element_type=jnp.float32) + b2.reshape(1, -1).astype(jnp.float32)
    return jax.nn.softmax(logits, axis=-1)


if __name__ == "__main__":
    # obs_dim=32, hidden=128, action_space=8; batch big enough to exercise the 2-tile split.
    B, IN, HID, OUT = 512, 32, 128, 8
    key = jax.random.PRNGKey(0)
    kx, kp, kp_sl = jax.random.split(key, 3)
    x = jax.random.normal(kx, (B, IN), jnp.float32)

    # --- multilayer policy: one-time weight prep, then the hot-path forward ---
    w1, b1, w2, b2 = init_params(kp, IN, OUT, is_multilayer=True, num_hidden=HID)
    prepared = prepare_params(w1, b1, w2, b2)     # hoisted out of the hot path
    out = jax.block_until_ready(nn_policy_forward_prepared(x, prepared))
    ref = nn_policy_ref(x, w1, b1, w2, b2)
    assert out.shape == (B, OUT)
    assert jnp.allclose(jnp.sum(out, axis=-1), 1.0, atol=1e-4)   # exact normalization
    assert jnp.allclose(out, ref, atol=5e-3, rtol=5e-3)

    # --- small batch (latency path: single 8-row tile, no batch padding, no post-slice) ---
    out_small = jax.block_until_ready(nn_policy_forward_prepared(x[:8], prepared))
    assert out_small.shape == (8, OUT)
    assert jnp.allclose(out_small, ref[:8], atol=5e-3, rtol=5e-3)

    # --- single-layer policy: Linear -> Softmax (no ReLU, no second matmul) ---
    w1s, b1s, _, _ = init_params(kp_sl, IN, OUT, is_multilayer=False)
    out_sl = jax.block_until_ready(nn_policy_forward(x[:8], w1s, b1s, None, None))
    ref_sl = nn_policy_ref(x[:8], w1s, b1s)
    assert out_sl.shape == (8, OUT)
    assert jnp.allclose(jnp.sum(out_sl, axis=-1), 1.0, atol=1e-4)
    assert jnp.allclose(out_sl, ref_sl, atol=5e-3, rtol=5e-3)

    # TODO(synk): get_probs (gather) and sample_action (multinomial) remain host-side utilities
    # over the forward output; fusing Gumbel-max sampling via pltpu.prng_random_bits into the
    # kernel (emitting a (B,) int32) would remove the probs HBM round-trip entirely.
    print("KERNEL_OK")
</pallas_src>

<mosaic_0001>
module attributes {stable_mosaic.version = 11 : i64} {
  func.func @nn_policy_ml_kernel(%arg0: i32, %arg1: memref<256x32xf32, #tpu.memory_space<vmem>>, %arg2: memref<32x128xbf16, #tpu.memory_space<vmem>>, %arg3: memref<1x128xf32, #tpu.memory_space<vmem>>, %arg4: memref<128x128xbf16, #tpu.memory_space<vmem>>, %arg5: memref<1x128xf32, #tpu.memory_space<vmem>>, %arg6: memref<256x8xf32, #tpu.memory_space<vmem>>) attributes {dimension_semantics = [#tpu.dimension_semantics<parallel>], iteration_bounds = array<i64: 2>, scalar_prefetch = 0 : i64, scratch_operands = 0 : i64, tpu.core_type = #tpu.core_type<tc>, window_params = [{transform_indices = @transform_0, window_bounds = array<i64: 256, 32>}, {pipeline_mode = #tpu.pipeline_mode<synchronous>, transform_indices = @transform_1, window_bounds = array<i64: 32, 128>}, {pipeline_mode = #tpu.pipeline_mode<synchronous>, transform_indices = @transform_2, window_bounds = array<i64: 1, 128>}, {pipeline_mode = #tpu.pipeline_mode<synchronous>, transform_indices = @transform_3, window_bounds = array<i64: 128, 128>}, {pipeline_mode = #tpu.pipeline_mode<synchronous>, transform_indices = @transform_4, window_bounds = array<i64: 1, 128>}, {transform_indices = @transform_5, window_bounds = array<i64: 256, 8>}]} {
    %c0 = arith.constant 0 : index
    %c0_0 = arith.constant 0 : index
    %0 = vector.load %arg1[%c0, %c0_0] : memref<256x32xf32, #tpu.memory_space<vmem>>, vector<256x32xf32>
    %1 = arith.truncf %0 : vector<256x32xf32> to vector<256x32xbf16>
    %c0_1 = arith.constant 0 : index
    %c0_2 = arith.constant 0 : index
    %2 = vector.load %arg2[%c0_1, %c0_2] : memref<32x128xbf16, #tpu.memory_space<vmem>>, vector<32x128xbf16>
    %cst = arith.constant dense<0.000000e+00> : vector<256x128xf32>
    %3 = tpu.matmul %1, %2, %cst {dimension_numbers = #tpu.dot_dimension_numbers<[1], [0], [0], [1], [0, 0, 1, 1], [], []>} : vector<256x32xbf16>, vector<32x128xbf16>, vector<256x128xf32> -> vector<256x128xf32>
    %c0_3 = arith.constant 0 : index
    %c0_4 = arith.constant 0 : index
    %4 = vector.load %arg3[%c0_3, %c0_4] : memref<1x128xf32, #tpu.memory_space<vmem>>, vector<1x128xf32>
    %5 = vector.broadcast %4 : vector<1x128xf32> to vector<256x128xf32>
    %6 = arith.addf %3, %5 : vector<256x128xf32>
    %cst_5 = arith.constant 0.000000e+00 : f32
    %7 = vector.broadcast %cst_5 : f32 to vector<256x128xf32>
    %8 = arith.maximumf %6, %7 : vector<256x128xf32>
    %9 = arith.truncf %8 : vector<256x128xf32> to vector<256x128xbf16>
    %c0_6 = arith.constant 0 : index
    %c0_7 = arith.constant 0 : index
    %10 = vector.load %arg4[%c0_6, %c0_7] : memref<128x128xbf16, #tpu.memory_space<vmem>>, vector<128x128xbf16>
    %cst_8 = arith.constant dense<0.000000e+00> : vector<256x128xf32>
    %11 = tpu.matmul %9, %10, %cst_8 {dimension_numbers = #tpu.dot_dimension_numbers<[1], [0], [0], [1], [0, 0, 1, 1], [], []>} : vector<256x128xbf16>, vector<128x128xbf16>, vector<256x128xf32> -> vector<256x128xf32>
    %c0_9 = arith.constant 0 : index
    %c0_10 = arith.constant 0 : index
    %12 = vector.load %arg5[%c0_9, %c0_10] : memref<1x128xf32, #tpu.memory_space<vmem>>, vector<1x128xf32>
    %13 = vector.broadcast %12 : vector<1x128xf32> to vector<256x128xf32>
    %14 = arith.addf %11, %13 : vector<256x128xf32>
    %cst_11 = arith.constant dense<0xFF800000> : vector<256xf32>
    %15 = vector.multi_reduction <maximumf>, %14, %cst_11 [1] : vector<256x128xf32> to vector<256xf32>
    %16 = vector.shape_cast %15 : vector<256xf32> to vector<256x1xf32>
    %17 = vector.broadcast %16 : vector<256x1xf32> to vector<256x128xf32>
    %18 = arith.subf %14, %17 : vector<256x128xf32>
    %19 = math.exp %18 : vector<256x128xf32>
    %cst_12 = arith.constant dense<0.000000e+00> : vector<256xf32>
    %20 = vector.multi_reduction <add>, %19, %cst_12 [1] : vector<256x128xf32> to vector<256xf32>
    %21 = vector.shape_cast %20 : vector<256xf32> to vector<256x1xf32>
    %22 = vector.broadcast %21 : vector<256x1xf32> to vector<256x128xf32>
    %23 = arith.divf %19, %22 : vector<256x128xf32>
    %24 = vector.extract_strided_slice %23 {offsets = [0, 0], sizes = [256, 8], strides = [1, 1]} : vector<256x128xf32> to vector<256x8xf32>
    %c0_13 = arith.constant 0 : index
    %c0_14 = arith.constant 0 : index
    %25 = vector.load %arg6[%c0_13, %c0_14] : memref<256x8xf32, #tpu.memory_space<vmem>>, vector<256x8xf32>
    tpu.vector_store %arg6[%c0_13, %c0_14], %24 {strides = array<i32>} : memref<256x8xf32, #tpu.memory_space<vmem>>, vector<256x8xf32>,
    return
  }
  func.func @transform_0(%arg0: i32) -> (i32, i32) {
    %c0_i32 = arith.constant 0 : i32
    %c0_i32_0 = arith.constant 0 : i32
    return %arg0, %c0_i32 : i32, i32
  }
  func.func @transform_1(%arg0: i32) -> (i32, i32) {
    %c0_i32 = arith.constant 0 : i32
    %c0_i32_0 = arith.constant 0 : i32
    %c0_i32_1 = arith.constant 0 : i32
    return %c0_i32, %c0_i32_0 : i32, i32
  }
  func.func @transform_2(%arg0: i32) -> (i32, i32) {
    %c0_i32 = arith.constant 0 : i32
    %c0_i32_0 = arith.constant 0 : i32
    %c0_i32_1 = arith.constant 0 : i32
    return %c0_i32, %c0_i32_0 : i32, i32
  }
  func.func @transform_3(%arg0: i32) -> (i32, i32) {
    %c0_i32 = arith.constant 0 : i32
    %c0_i32_0 = arith.constant 0 : i32
    %c0_i32_1 = arith.constant 0 : i32
    return %c0_i32, %c0_i32_0 : i32, i32
  }
  func.func @transform_4(%arg0: i32) -> (i32, i32) {
    %c0_i32 = arith.constant 0 : i32
    %c0_i32_0 = arith.constant 0 : i32
    %c0_i32_1 = arith.constant 0 : i32
    return %c0_i32, %c0_i32_0 : i32, i32
  }
  func.func @transform_5(%arg0: i32) -> (i32, i32) {
    %c0_i32 = arith.constant 0 : i32
    %c0_i32_0 = arith.constant 0 : i32
    return %arg0, %c0_i32 : i32, i32
  }
}

</mosaic_0001>

<bundles_post_ra>
// kernel: tpu_custom_call.1
= control target key start
LH: loop header
LB: loop body
LE: loop exit
PB: predicated region body
PF: predicated region fallthrough
CT: control target
= control target key end

     0   :  { %s1532_s18 = smov 0   ;;  %s2032_s0 = inlined_call_operand.vmem [shape: f32[512,32], index: 0, kind: input, shape index: {}]   ;;  %s2033_s1 = inlined_call_operand.vmem [shape: bf16[32,128], index: 1, kind: input, shape index: {}]   ;;  %s2034_s2 = inlined_call_operand.vmem [shape: f32[1,128], index: 2, kind: input, shape index: {}]   ;;  %s2035_s3 = inlined_call_operand.vmem [shape: bf16[128,128], index: 3, kind: input, shape index: {}]   ;;  %s2036_s4 = inlined_call_operand.vmem [shape: f32[1,128], index: 4, kind: input, shape index: {}]   ;;  %s2037_s5 = inlined_call_operand.vmem [shape: f32[512,8], index: 5, kind: output, shape index: {}]  }
   0x1 LB: > { %s1167_s19 = sadd.s32 4294967295, %s1500_s18   ;;  %p1171_p0 = scmp.ge.s32.totalorder %s1500_s18, 1  ;;  %s1500_s18 = sphi %s1532_s18, %s15_s18  }
   0x2   : > { %p188_p1 = scmp.lt.s32.totalorder %s1500_s18, 3 }
   0x4   : > { %p189_p2 = pnand %p1171_p0, %p188_p1 }
   0x5   : > { %v1356_v0 = vld [vmem:[%s2033_s1] sm:$0xff] (!%p189_p2)   ;;  %s1172_s22 = sshll.u32 (!%p189_p2), %s1167_s19, 5  ;;  %v1357_v1 = vld [vmem:[%s2033_s1 + $0x8] sm:$0xff] (!%p189_p2)   ;;  %v1360_v4 = vld [vmem:[%s2035_s3 + $0x10] sm:$0xff] (!%p189_p2)   ;;  %vm300_vm0 = vcmask (!%p189_p2), 261120   ;;  %vm1078_vm1 = vcmask (!%p189_p2), 64512  }
   0x6   : > { %192 = sbr.rel (%p189_p2) target bundleno = 833 (0x341), region = 40  ;;  %p217_p3 = scmp.lt.s32.totalorder (!%p189_p2), %s1172_s22, 63  ;;  %1248 = vmatprep.subr.bf16.mxu0 (!%p189_p2), %v1356_v0  ;;  %v1358_v2 = vld [vmem:[%s2035_s3] sm:$0xff] (!%p189_p2)   ;;  %v1359_v3 = vld [vmem:[%s2035_s3 + $0x8] sm:$0xff] (!%p189_p2)   ;;  %v1361_v16 = vld [vmem:[%s2035_s3 + $0x18] sm:$0xff] (!%p189_p2)  }
   0x7   : > { %1249 = vmatpush3.bf16.msra.mxu0 (!%p189_p2), %v1356_v0  ;;  %1332 = vmatprep.subr.bf16.mxu1 (!%p189_p2), %v1358_v2  ;;  %v1362_v21 = vld [vmem:[%s2035_s3 + $0x20] sm:$0xff] (!%p189_p2)   ;;  %v1363_v24 = vld [vmem:[%s2035_s3 + $0x28] sm:$0xff] (!%p189_p2)   ;;  %v1364_v29 = vld [vmem:[%s2035_s3 + $0x30] sm:$0xff] (!%p189_p2)  }
   0x8   : > { %1250 = vmatprep.subr.bf16.mxu0 (!%p189_p2), %v1357_v1  ;;  %1340 = vmatpush3.bf16.msra.mxu1 (!%p189_p2), %v1358_v2  ;;  %v1365_v57 = vld [vmem:[%s2035_s3 + $0x38] sm:$0xff] (!%p189_p2)   ;;  %v1631_v58 = vld [vmem:[%s2034_s2] ss:$0 sm:$0xff] (!%p189_p2) }
   0x9   : > { %1333 = vmatprep.subr.bf16.mxu1 (!%p189_p2), %v1359_v3 }
   0xb   : > { %1251 = vmatpush3.bf16.msra.mxu0 (!%p189_p2), %v1357_v1 }
   0xc   : > { %1284 = vmatprep.subr.bf16.mxu0 (!%p189_p2), %v1358_v2  ;;  %1341 = vmatpush3.bf16.msra.mxu1 (!%p189_p2), %v1359_v3 }
   0xd   : > { %s2039_s22 = smov (!%p217_p3, %s1172_s22), 63  ;;  %1334 = vmatprep.subr.bf16.mxu1 %v1360_v4 }
   0xe   : > { %s1173_s29 = sshll.u32 %s2039_s22, 3 }
   0xf   : > { %s1560_s7 = scalar_lea.vmem %s2032_s0, %s1173_s29  ;;  %s1931_s28 = scalar_lea.vmem %s2037_s5, %s1173_s29 }
  0x10   : > { %v229_v5 = vld [vmem:[%s1560_s7] sm:$0xff]  ;;  %v230_v6 = vld [vmem:[%s1560_s7 + $0x8] sm:$0xff]  ;;  %v231_v7 = vld [vmem:[%s1560_s7 + $0x10] sm:$0xff]  ;;  %1342 = vmatpush3.bf16.msra.mxu1 %v1360_v4 }
  0x11   : > { %v261_v8 = vpack.c.bf16 %v230_v6, %v229_v5  ;;  %v232_v9 = vld [vmem:[%s1560_s7 + $0x18] sm:$0xff]  ;;  %v233_v10 = vld [vmem:[%s1560_s7 + $0x20] sm:$0xff]  ;;  %v234_v11 = vld [vmem:[%s1560_s7 + $0x28] sm:$0xff]  ;;  %1335 = vmatprep.subr.bf16.mxu1 %v1361_v16 }
  0x12   : > { %v262_v12 = vpack.c.bf16 %v232_v9, %v231_v7  ;;  %v263_v13 = vpack.c.bf16 %v234_v11, %v233_v10  ;;  %v235_v14 = vld [vmem:[%s1560_s7 + $0x30] sm:$0xff]  ;;  %v236_v15 = vld [vmem:[%s1560_s7 + $0x38] sm:$0xff]  ;;  %v237_v17 = vld [vmem:[%s1560_s7 + $0x40] sm:$0xff] }
  0x13   : > { %1252 = vmatprep.mubr.msk.bf16.mxu0 %vm300_vm0, %v261_v8  ;;  %v238_v18 = vld [vmem:[%s1560_s7 + $0x48] sm:$0xff]  ;;  %v264_v19 = vpack.c.bf16 %v236_v15, %v235_v14  ;;  %v239_v22 = vld [vmem:[%s1560_s7 + $0x50] sm:$0xff]  ;;  %v240_v23 = vld [vmem:[%s1560_s7 + $0x58] sm:$0xff] }
  0x14   : > { %1253 = vmatmul.mubr.msk.bf16.vlgmr.msra.gmra.mrb[0].mxu0 %vm300_vm0, %v262_v12  ;;  %v265_v20 = vpack.c.bf16 %v238_v18, %v237_v17  ;;  %1343 = vmatpush3.bf16.msra.mxu1 %v1361_v16  ;;  %v241_v25 = vld [vmem:[%s1560_s7 + $0x60] sm:$0xff]  ;;  %v242_v26 = vld [vmem:[%s1560_s7 + $0x68] sm:$0xff]  ;;  %v266_v27 = vpack.c.bf16 %v240_v23, %v239_v22  ;;  %v243_v30 = vld [vmem:[%s1560_s7 + $0x70] sm:$0xff] }
  0x15   : > { %1256 = vmatprep.mubr.msk.bf16.mxu0 %vm300_vm0, %v263_v13  ;;  %1285 = vmatpush3.bf16.msra.mxu0 %v1358_v2  ;;  %v267_v28 = vpack.c.bf16 %v242_v26, %v241_v25  ;;  %v244_v31 = vld [vmem:[%s1560_s7 + $0x78] sm:$0xff]  ;;  %v245_v32 = vld [vmem:[%s1560_s7 + $0x80] sm:$0xff]  ;;  %v246_v33 = vld [vmem:[%s1560_s7 + $0x88] sm:$0xff] }
  0x16   : > { %1286 = vmatprep.subr.bf16.mxu0 %v1359_v3  ;;  %1336 = vmatprep.subr.bf16.mxu1 %v1362_v21  ;;  %v268_v34 = vpack.c.bf16 %v244_v31, %v243_v30  ;;  %v269_v35 = vpack.c.bf16 %v246_v33, %v245_v32  ;;  %v247_v36 = vld [vmem:[%s1560_s7 + $0x90] sm:$0xff]  ;;  %v248_v37 = vld [vmem:[%s1560_s7 + $0x98] sm:$0xff]  ;;  %v249_v38 = vld [vmem:[%s1560_s7 + $0xa0] sm:$0xff] }
  0x17   : > { %v250_v39 = vld [vmem:[%s1560_s7 + $0xa8] sm:$0xff]  ;;  %v270_v40 = vpack.c.bf16 %v248_v37, %v247_v36  ;;  %v251_v42 = vld [vmem:[%s1560_s7 + $0xb0] sm:$0xff]  ;;  %v252_v43 = vld [vmem:[%s1560_s7 + $0xb8] sm:$0xff] }
  0x18   : > { %1344 = vmatpush3.bf16.msra.mxu1 %v1362_v21  ;;  %v271_v41 = vpack.c.bf16 %v250_v39, %v249_v38  ;;  %v253_v44 = vld [vmem:[%s1560_s7 + $0xc0] sm:$0xff]  ;;  %v254_v45 = vld [vmem:[%s1560_s7 + $0xc8] sm:$0xff]  ;;  %v272_v46 = vpack.c.bf16 %v252_v43, %v251_v42  ;;  %v255_v48 = vld [vmem:[%s1560_s7 + $0xd0] sm:$0xff] }
  0x19   : > { %1287 = vmatpush3.bf16.msra.mxu0 %v1359_v3  ;;  %1337 = vmatprep.subr.bf16.mxu1 %v1363_v24  ;;  %v273_v47 = vpack.c.bf16 %v254_v45, %v253_v44  ;;  %v256_v49 = vld [vmem:[%s1560_s7 + $0xd8] sm:$0xff]  ;;  %v257_v50 = vld [vmem:[%s1560_s7 + $0xe0] sm:$0xff]  ;;  %v258_v51 = vld [vmem:[%s1560_s7 + $0xe8] sm:$0xff] }
  0x1a   : > { %1288 = vmatprep.subr.bf16.mxu0 %v1360_v4  ;;  %v274_v52 = vpack.c.bf16 %v256_v49, %v255_v48  ;;  %v275_v53 = vpack.c.bf16 %v258_v51, %v257_v50  ;;  %v259_v54 = vld [vmem:[%s1560_s7 + $0xf0] sm:$0xff]  ;;  %v260_v55 = vld [vmem:[%s1560_s7 + $0xf8] sm:$0xff] }
  0x1b   : > { %v276_v56 = vpack.c.bf16 %v260_v55, %v259_v54 }
  0x1c   : > { %1257 = vmatmul.mubr.msk.bf16.gmra.mrb[4].mxu0 %vm300_vm0, %v264_v19  ;;  %1345 = vmatpush3.bf16.msra.mxu1 %v1363_v24 }
  0x1d   : > { %1260 = vmatprep.mubr.msk.bf16.mxu0 %vm300_vm0, %v265_v20  ;;  %1289 = vmatpush3.bf16.msra.mxu0 %v1360_v4 }
  0x1e   : > { %1290 = vmatprep.subr.bf16.mxu0 %v1361_v16  ;;  %1338 = vmatprep.subr.bf16.mxu1 %v1364_v29 }
  0x20   : > { %1346 = vmatpush3.bf16.msra.mxu1 %v1364_v29 }
  0x21   : > { %1291 = vmatpush3.bf16.msra.mxu0 %v1361_v16  ;;  %1339 = vmatprep.subr.bf16.mxu1 %v1365_v57 }
  0x22   : > { %1292 = vmatprep.subr.bf16.mxu0 %v1362_v21 }
  0x24   : > { %1261 = vmatmul.mubr.msk.bf16.gmra.mrb[8].mxu0 %vm300_vm0, %v266_v27  ;;  %1347 = vmatpush3.bf16.msra.mxu1 %v1365_v57 }
  0x25   : > { %1264 = vmatprep.mubr.msk.bf16.mxu0 %vm300_vm0, %v267_v28  ;;  %1293 = vmatpush3.bf16.msra.mxu0 %v1362_v21 }
  0x26   : > { %1294 = vmatprep.subr.bf16.mxu0 %v1363_v24 }
  0x29   : > { %1295 = vmatpush3.bf16.msra.mxu0 %v1363_v24 }
  0x2a   : > { %1296 = vmatprep.subr.bf16.mxu0 %v1364_v29 }
  0x2c   : > { %1265 = vmatmul.mubr.msk.bf16.gmra.mrb[12].mxu0 %vm300_vm0, %v268_v34 }
  0x2d   : > { %1268 = vmatprep.mubr.msk.bf16.mxu0 %vm300_vm0, %v269_v35  ;;  %1297 = vmatpush3.bf16.msra.mxu0 %v1364_v29 }
  0x2e   : > { %1298 = vmatprep.subr.bf16.mxu0 %v1365_v57 }
  0x31   : > { %1299 = vmatpush3.bf16.msra.mxu0 %v1365_v57 }
  0x34   : > { %1269 = vmatmul.mubr.msk.bf16.gmra.mrb[16].mxu0 %vm300_vm0, %v270_v40 }
  0x35   : > { %1272 = vmatprep.mubr.msk.bf16.mxu0 %vm300_vm0, %v271_v41 }
  0x3c   : > { %1273 = vmatmul.mubr.msk.bf16.gmra.mrb[20].mxu0 %vm300_vm0, %v272_v46 }
  0x3d   : > { %1276 = vmatprep.mubr.msk.bf16.mxu0 %vm300_vm0, %v273_v47 }
  0x44   : > { %1277 = vmatmul.mubr.msk.bf16.gmra.mrb[24].mxu0 %vm300_vm0, %v274_v52 }
  0x45   : > { %1280 = vmatprep.mubr.msk.bf16.mxu0 %vm300_vm0, %v275_v53 }
  0x4c   : > { %1281 = vmatmul.mubr.msk.bf16.gmra.mrb[28].mxu0 %vm300_vm0, %v276_v56 }
  0xe7   : > { %v1254_v59 = vpop.f32.mrb[0].mxu0 }
  0xe8   : > { %v392_v60 = vadd.f32 %v1254_v59, %v1631_v58  ;;  %v383_v61 = vpop.f32.mrb[1].mxu0 }
  0xe9   : > { %v384_v62 = vadd.f32 %v1631_v58, %v383_v61  ;;  %v1255_v63 = vpop.f32.mrb[2].mxu0 }
  0xea   : > { %v395_v0 = vadd.f32 %v1255_v63, %v1631_v58  ;;  %v386_v1 = vpop.f32.mrb[3].mxu0  ;;  %v512_v3 = vmax.f32 %v392_v60, 0.0 }
  0xeb   : > { %v387_v2 = vadd.f32 %v1631_v58, %v386_v1  ;;  %v510_v5 = vmax.f32 %v384_v62, 0.0 }
  0xec   : > { %v513_v4 = vmax.f32 %v395_v0, 0.0 }
  0xed   : > { %v511_v6 = vmax.f32 %v387_v2, 0.0 }
  0xee   : > { %v543_v7 = vpack.c.bf16 %v513_v4, %v512_v3 }
  0xef   : > { %v542_v8 = vpack.c.bf16 %v511_v6, %v510_v5  ;;  %v1258_v9 = vpop.f32.mrb[4].mxu0 }
  0xf0   : > { %v408_v10 = vadd.f32 %v1258_v9, %v1631_v58  ;;  %v399_v11 = vpop.f32.mrb[5].mxu0 }
  0xf1   : > { %v400_v12 = vadd.f32 %v1631_v58, %v399_v11  ;;  %v1259_v13 = vpop.f32.mrb[6].mxu0  ;;  %1300 = vmatprep.mubr.bf16.mxu0 %v542_v8 }
  0xf2   : > { %v516_v14 = vmax.f32 %v408_v10, 0.0  ;;  %v411_v15 = vadd.f32 %v1259_v13, %v1631_v58  ;;  %v402_v16 = vpop.f32.mrb[7].mxu0  ;;  %1301 = vmatmul.mubr.bf16.vlgmr.msra.gmra.mrb[32].mxu0 %v543_v7 }
  0xf3   : > { %v403_v17 = vadd.f32 %v1631_v58, %v402_v16  ;;  %v514_v19 = vmax.f32 %v400_v12, 0.0 }
  0xf4   : > { %v517_v18 = vmax.f32 %v411_v15, 0.0 }
  0xf5   : > { %v515_v20 = vmax.f32 %v403_v17, 0.0 }
  0xf6   : > { %v545_v21 = vpack.c.bf16 %v517_v18, %v516_v14 }
  0xf7   : > { %v1262_v22 = vpop.f32.mrb[8].mxu0  ;;  %v544_v23 = vpack.c.bf16 %v515_v20, %v514_v19 }
  0xf8   : > { %v424_v24 = vadd.f32 %v1262_v22, %v1631_v58  ;;  %v415_v25 = vpop.f32.mrb[9].mxu0 }
  0xf9   : > { %v416_v26 = vadd.f32 %v1631_v58, %v415_v25  ;;  %v1263_v27 = vpop.f32.mrb[10].mxu0  ;;  %1304 = vmatprep.mubr.bf16.mxu1 %v544_v23 }
  0xfa   : > { %v520_v28 = vmax.f32 %v424_v24, 0.0  ;;  %v427_v29 = vadd.f32 %v1263_v27, %v1631_v58  ;;  %v418_v30 = vpop.f32.mrb[11].mxu0  ;;  %1305 = vmatmul.mubr.bf16.vlgmr.msra.gmra.mrb[0].mxu1 %v545_v21 }
  0xfb   : > { %v419_v31 = vadd.f32 %v1631_v58, %v418_v30  ;;  %v518_v33 = vmax.f32 %v416_v26, 0.0 }
  0xfc   : > { %v521_v32 = vmax.f32 %v427_v29, 0.0 }
  0xfd   : > { %v519_v34 = vmax.f32 %v419_v31, 0.0 }
  0xfe   : > { %v547_v35 = vpack.c.bf16 %v521_v32, %v520_v28 }
  0xff   : > { %v546_v36 = vpack.c.bf16 %v519_v34, %v518_v33  ;;  %v1266_v37 = vpop.f32.mrb[12].mxu0 }
 0x100   : > { %v440_v38 = vadd.f32 %v1266_v37, %v1631_v58  ;;  %v431_v39 = vpop.f32.mrb[13].mxu0 }
 0x101   : > { %v432_v40 = vadd.f32 %v1631_v58, %v431_v39  ;;  %v1267_v41 = vpop.f32.mrb[14].mxu0  ;;  %1308 = vmatprep.mubr.bf16.mxu1 %v546_v36 }
 0x102   : > { %v524_v42 = vmax.f32 %v440_v38, 0.0  ;;  %v443_v43 = vadd.f32 %v1267_v41, %v1631_v58  ;;  %v434_v44 = vpop.f32.mrb[15].mxu0  ;;  %1309 = vmatmul.mubr.bf16.gmra.mrb[4].mxu1 %v547_v35 }
 0x103   : > { %v435_v45 = vadd.f32 %v1631_v58, %v434_v44  ;;  %v522_v47 = vmax.f32 %v432_v40, 0.0  ;;  %v1668_v44 = vld [vmem:[%s2036_s4] ss:$0 sm:$0xff] }
 0x104   : > { %v525_v46 = vmax.f32 %v443_v43, 0.0 }
 0x105   : > { %v523_v48 = vmax.f32 %v435_v45, 0.0 }
 0x106   : > { %v549_v49 = vpack.c.bf16 %v525_v46, %v524_v42 }
 0x107   : > { %v548_v50 = vpack.c.bf16 %v523_v48, %v522_v47  ;;  %v1270_v51 = vpop.f32.mrb[16].mxu0 }
 0x108   : > { %v456_v52 = vadd.f32 %v1270_v51, %v1631_v58  ;;  %v447_v53 = vpop.f32.mrb[17].mxu0 }
 0x109   : > { %v448_v54 = vadd.f32 %v1631_v58, %v447_v53  ;;  %v1271_v55 = vpop.f32.mrb[18].mxu0  ;;  %1312 = vmatprep.mubr.bf16.mxu1 %v548_v50 }
 0x10a   : > { %v528_v56 = vmax.f32 %v456_v52, 0.0  ;;  %v459_v57 = vadd.f32 %v1271_v55, %v1631_v58  ;;  %v450_v59 = vpop.f32.mrb[19].mxu0  ;;  %1313 = vmatmul.mubr.bf16.gmra.mrb[8].mxu1 %v549_v49 }
 0x10b   : > { %v451_v60 = vadd.f32 %v1631_v58, %v450_v59  ;;  %v526_v62 = vmax.f32 %v448_v54, 0.0 }
 0x10c   : > { %v529_v61 = vmax.f32 %v459_v57, 0.0 }
 0x10d   : > { %v527_v63 = vmax.f32 %v451_v60, 0.0 }
 0x10e   : > { %v551_v0 = vpack.c.bf16 %v529_v61, %v528_v56 }
 0x10f   : > { %v550_v1 = vpack.c.bf16 %v527_v63, %v526_v62  ;;  %v1274_v2 = vpop.f32.mrb[20].mxu0 }
 0x110   : > { %v472_v3 = vadd.f32 %v1274_v2, %v1631_v58  ;;  %v463_v4 = vpop.f32.mrb[21].mxu0 }
 0x111   : > { %v464_v5 = vadd.f32 %v1631_v58, %v463_v4  ;;  %v1275_v6 = vpop.f32.mrb[22].mxu0  ;;  %1316 = vmatprep.mubr.bf16.mxu1 %v550_v1 }
 0x112   : > { %v532_v7 = vmax.f32 %v472_v3, 0.0  ;;  %v475_v8 = vadd.f32 %v1275_v6, %v1631_v58  ;;  %v466_v9 = vpop.f32.mrb[23].mxu0  ;;  %1317 = vmatmul.mubr.bf16.gmra.mrb[12].mxu1 %v551_v0 }
 0x113   : > { %v467_v10 = vadd.f32 %v1631_v58, %v466_v9  ;;  %v530_v12 = vmax.f32 %v464_v5, 0.0 }
 0x114   : > { %v533_v11 = vmax.f32 %v475_v8, 0.0 }
 0x115   : > { %v531_v13 = vmax.f32 %v467_v10, 0.0 }
 0x116   : > { %v553_v14 = vpack.c.bf16 %v533_v11, %v532_v7 }
 0x117   : > { %v552_v15 = vpack.c.bf16 %v531_v13, %v530_v12  ;;  %v1278_v16 = vpop.f32.mrb[24].mxu0 }
 0x118   : > { %v488_v17 = vadd.f32 %v1278_v16, %v1631_v58  ;;  %v479_v18 = vpop.f32.mrb[25].mxu0 }
 0x119   : > { %v480_v19 = vadd.f32 %v1631_v58, %v479_v18  ;;  %v1279_v20 = vpop.f32.mrb[26].mxu0  ;;  %1320 = vmatprep.mubr.bf16.mxu1 %v552_v15 }
 0x11a   : > { %v536_v21 = vmax.f32 %v488_v17, 0.0  ;;  %v491_v22 = vadd.f32 %v1279_v20, %v1631_v58  ;;  %v482_v23 = vpop.f32.mrb[27].mxu0  ;;  %1321 = vmatmul.mubr.bf16.gmra.mrb[16].mxu1 %v553_v14 }
 0x11b   : > { %v483_v24 = vadd.f32 %v1631_v58, %v482_v23  ;;  %v534_v26 = vmax.f32 %v480_v19, 0.0 }
 0x11c   : > { %v537_v25 = vmax.f32 %v491_v22, 0.0 }
 0x11d   : > { %v535_v27 = vmax.f32 %v483_v24, 0.0 }
 0x11e   : > { %v555_v28 = vpack.c.bf16 %v537_v25, %v536_v21 }
 0x11f   : > { %v554_v29 = vpack.c.bf16 %v535_v27, %v534_v26  ;;  %v1282_v30 = vpop.f32.mrb[28].mxu0 }
 0x120   : > { %v504_v31 = vadd.f32 %v1282_v30, %v1631_v58  ;;  %v495_v32 = vpop.f32.mrb[29].mxu0 }
 0x121   : > { %v496_v33 = vadd.f32 %v1631_v58, %v495_v32  ;;  %v1283_v34 = vpop.f32.mrb[30].mxu0  ;;  %1324 = vmatprep.mubr.bf16.mxu1 %v554_v29 }
 0x122   : > { %v540_v35 = vmax.f32 %v504_v31, 0.0  ;;  %v507_v36 = vadd.f32 %v1283_v34, %v1631_v58  ;;  %v498_v37 = vpop.f32.mrb[31].mxu0  ;;  %1325 = vmatmul.mubr.bf16.gmra.mrb[20].mxu1 %v555_v28 }
 0x123   : > { %v499_v38 = vadd.f32 %v1631_v58, %v498_v37  ;;  %v538_v40 = vmax.f32 %v496_v33, 0.0 }
 0x124   : > { %v541_v39 = vmax.f32 %v507_v36, 0.0 }
 0x125   : > { %v539_v41 = vmax.f32 %v499_v38, 0.0 }
 0x126   : > { %v557_v42 = vpack.c.bf16 %v541_v39, %v540_v35 }
 0x127   : > { %v556_v43 = vpack.c.bf16 %v539_v41, %v538_v40 }
 0x129   : > { %1328 = vmatprep.mubr.bf16.mxu1 %v556_v43 }
 0x12a   : > { %1329 = vmatmul.mubr.bf16.gmra.mrb[24].mxu1 %v557_v42 }
 0x1c5   : > { %v1302_v45 = vpop.f32.mrb[32].mxu0 }
 0x1c6   : > { %v1671_v46 = vadd.f32 %v1302_v45, %v1668_v44  ;;  %v663_v47 = vpop.f32.mrb[33].mxu0 }
 0x1c7   : > { %v1674_v48 = vadd.f32 %v1668_v44, %v663_v47  ;;  %v1303_v58 = vpop.f32.mrb[34].mxu0 }
 0x1c8   : > { %794 = vmax.xlane.f32.xlu1 %v1671_v46  ;;  %v666_v49 = vpop.f32.mrb[35].mxu0  ;;  %v1679_v50 = vadd.f32 %v1303_v58, %v1668_v44 }
 0x1c9   : > { %790 = vmax.xlane.f32.xlu0 %v1674_v48  ;;  %v1682_v51 = vadd.f32 %v1668_v44, %v666_v49 }
 0x1cc   : > { %796 = vmax.xlane.f32.xlu1 %v1679_v50 }
 0x1cd   : > { %v1306_v52 = vpop.f32.mrb[0].mxu1  ;;  %792 = vmax.xlane.f32.xlu0 %v1682_v51 }
 0x1ce   : > { %v1687_v53 = vadd.f32 %v1306_v52, %v1668_v44  ;;  %v679_v54 = vpop.f32.mrb[1].mxu1 }
 0x1cf   : > { %v1307_v55 = vpop.f32.mrb[2].mxu1  ;;  %v1695_v59 = vadd.f32 %v1668_v44, %v679_v54 }
 0x1d0   : > { %v1690_v56 = vadd.f32 %v1307_v55, %v1668_v44  ;;  %v682_v57 = vpop.f32.mrb[3].mxu1 }
 0x1d1   : > { %802 = vmax.xlane.f32.xlu0 %v1687_v53  ;;  %v1698_v60 = vadd.f32 %v1668_v44, %v682_v57 }
 0x1d2   : > { %804 = vmax.xlane.f32.xlu1 %v1690_v56 }
 0x1d5   : > { %v1310_v61 = vpop.f32.mrb[4].mxu1  ;;  %798 = vmax.xlane.f32.xlu0 %v1695_v59 }
 0x1d6   : > { %v1702_v62 = vadd.f32 %v1310_v61, %v1668_v44  ;;  %v695_v63 = vpop.f32.mrb[5].mxu1  ;;  %800 = vmax.xlane.f32.xlu1 %v1698_v60 }
 0x1d7   : > { %v1311_v0 = vpop.f32.mrb[6].mxu1  ;;  %v1711_v3 = vadd.f32 %v1668_v44, %v695_v63 }
 0x1d8   : > { %v1706_v1 = vadd.f32 %v1311_v0, %v1668_v44  ;;  %v698_v2 = vpop.f32.mrb[7].mxu1 }
 0x1d9   : > { %810 = vmax.xlane.f32.xlu0 %v1702_v62  ;;  %v1714_v4 = vadd.f32 %v1668_v44, %v698_v2 }
 0x1da   : > { %812 = vmax.xlane.f32.xlu1 %v1706_v1 }
 0x1dd   : > { %v1314_v5 = vpop.f32.mrb[8].mxu1  ;;  %806 = vmax.xlane.f32.xlu0 %v1711_v3 }
 0x1de   : > { %v1718_v6 = vadd.f32 %v1314_v5, %v1668_v44  ;;  %v711_v7 = vpop.f32.mrb[9].mxu1  ;;  %808 = vmax.xlane.f32.xlu1 %v1714_v4 }
 0x1df   : > { %v1315_v8 = vpop.f32.mrb[10].mxu1  ;;  %v1727_v11 = vadd.f32 %v1668_v44, %v711_v7 }
 0x1e0   : > { %v1722_v9 = vadd.f32 %v1315_v8, %v1668_v44  ;;  %v714_v10 = vpop.f32.mrb[11].mxu1 }
 0x1e1   : > { %818 = vmax.xlane.f32.xlu0 %v1718_v6  ;;  %v1730_v12 = vadd.f32 %v1668_v44, %v714_v10 }
 0x1e2   : > { %820 = vmax.xlane.f32.xlu1 %v1722_v9 }
 0x1e5   : > { %v1318_v13 = vpop.f32.mrb[12].mxu1  ;;  %814 = vmax.xlane.f32.xlu0 %v1727_v11 }
 0x1e6   : > { %v1734_v14 = vadd.f32 %v1318_v13, %v1668_v44  ;;  %v727_v15 = vpop.f32.mrb[13].mxu1  ;;  %816 = vmax.xlane.f32.xlu1 %v1730_v12 }
 0x1e7   : > { %v1319_v16 = vpop.f32.mrb[14].mxu1  ;;  %v1743_v19 = vadd.f32 %v1668_v44, %v727_v15 }
 0x1e8   : > { %v1738_v17 = vadd.f32 %v1319_v16, %v1668_v44  ;;  %v730_v18 = vpop.f32.mrb[15].mxu1 }
 0x1e9   : > { %826 = vmax.xlane.f32.xlu0 %v1734_v14  ;;  %v1746_v20 = vadd.f32 %v1668_v44, %v730_v18 }
 0x1ea   : > { %828 = vmax.xlane.f32.xlu1 %v1738_v17 }
 0x1ed   : > { %v1322_v21 = vpop.f32.mrb[16].mxu1  ;;  %822 = vmax.xlane.f32.xlu0 %v1743_v19 }
 0x1ee   : > { %v1750_v22 = vadd.f32 %v1322_v21, %v1668_v44  ;;  %v743_v23 = vpop.f32.mrb[17].mxu1  ;;  %824 = vmax.xlane.f32.xlu1 %v1746_v20 }
 0x1ef   : > { %v1323_v24 = vpop.f32.mrb[18].mxu1  ;;  %v1759_v27 = vadd.f32 %v1668_v44, %v743_v23 }
 0x1f0   : > { %v1754_v25 = vadd.f32 %v1323_v24, %v1668_v44  ;;  %v746_v26 = vpop.f32.mrb[19].mxu1 }
 0x1f1   : > { %834 = vmax.xlane.f32.xlu0 %v1750_v22  ;;  %v1762_v28 = vadd.f32 %v1668_v44, %v746_v26 }
 0x1f2   : > { %836 = vmax.xlane.f32.xlu1 %v1754_v25 }
 0x1f5   : > { %v1326_v29 = vpop.f32.mrb[20].mxu1  ;;  %830 = vmax.xlane.f32.xlu0 %v1759_v27 }
 0x1f6   : > { %v1766_v30 = vadd.f32 %v1326_v29, %v1668_v44  ;;  %v759_v31 = vpop.f32.mrb[21].mxu1  ;;  %832 = vmax.xlane.f32.xlu1 %v1762_v28 }
 0x1f7   : > { %v1327_v32 = vpop.f32.mrb[22].mxu1  ;;  %v1775_v35 = vadd.f32 %v1668_v44, %v759_v31 }
 0x1f8   : > { %v1770_v33 = vadd.f32 %v1327_v32, %v1668_v44  ;;  %v762_v34 = vpop.f32.mrb[23].mxu1 }
 0x1f9   : > { %842 = vmax.xlane.f32.xlu0 %v1766_v30  ;;  %v1778_v36 = vadd.f32 %v1668_v44, %v762_v34 }
 0x1fa   : > { %844 = vmax.xlane.f32.xlu1 %v1770_v33 }
 0x1fd   : > { %v1330_v37 = vpop.f32.mrb[24].mxu1  ;;  %838 = vmax.xlane.f32.xlu0 %v1775_v35 }
 0x1fe   : > { %v775_v38 = vpop.f32.mrb[25].mxu1  ;;  %840 = vmax.xlane.f32.xlu1 %v1778_v36  ;;  %v1790_v43 = vadd.f32 %v1330_v37, %v1668_v44 }
 0x1ff   : > { %v1783_v39 = vadd.f32 %v1668_v44, %v775_v38  ;;  %v1331_v40 = vpop.f32.mrb[26].mxu1 }
 0x200   : > { %v778_v41 = vpop.f32.mrb[27].mxu1  ;;  %v1794_v45 = vadd.f32 %v1331_v40, %v1668_v44 }
 0x201   : > { %v1786_v42 = vadd.f32 %v1668_v44, %v778_v41  ;;  %846 = vmax.xlane.f32.xlu0 %v1783_v39 }
 0x203   : > { %848 = vmax.xlane.f32.xlu1 %v1786_v42 }
 0x205   : > { %850 = vmax.xlane.f32.xlu0 %v1790_v43 }
 0x207   : > { %852 = vmax.xlane.f32.xlu1 %v1794_v45 }
 0x255   : > { %v795_v47 = vpop.xlane.xlu1 %794 }
 0x256   : > { %v856_v58 = vsub.f32 %v1671_v46, %v795_v47  ;;  %v791_v49 = vpop.xlane.xlu0 %790 }
 0x257   : > { %v854_v52 = vsub.f32 %v1674_v48, %v791_v49 }
 0x258   : > { %v890_v54 = vmul.f32 1.442695, %v856_v58 }
 0x259   : > { %v886_v55 = vmul.f32 1.442695, %v854_v52  ;;  %v797_v57 = vpop.xlane.xlu1 %796 }
 0x25a   : > { %1366 = vpow2.f32 %v890_v54  ;;  %v857_v61 = vsub.f32 %v1679_v50, %v797_v57  ;;  %v793_v63 = vpop.xlane.xlu0 %792 }
 0x25b   : > { %v855_v44 = vsub.f32 %v1682_v51, %v793_v63  ;;  %1368 = vpow2.f32 %v886_v55 }
 0x25c   : > { %v892_v0 = vmul.f32 1.442695, %v857_v61 }
 0x25d   : > { %v888_v2 = vmul.f32 1.442695, %v855_v44 }
 0x25e   : > { %1370 = vpow2.f32 %v892_v0  ;;  %v803_v5 = vpop.xlane.xlu0 %802 }
 0x25f   : > { %v860_v7 = vsub.f32 %v1687_v53, %v803_v5  ;;  %v805_v46 = vpop.xlane.xlu1 %804  ;;  %1372 = vpow2.f32 %v888_v2 }
 0x260   : > { %v861_v8 = vsub.f32 %v1690_v56, %v805_v46 }
 0x261   : > { %v898_v48 = vmul.f32 1.442695, %v860_v7 }
 0x262   : > { %v900_v10 = vmul.f32 1.442695, %v861_v8  ;;  %v799_v13 = vpop.xlane.xlu0 %798 }
 0x263   : > { %1374 = vpow2.f32 %v898_v48  ;;  %v858_v50 = vsub.f32 %v1695_v59, %v799_v13  ;;  %v801_v15 = vpop.xlane.xlu1 %800 }
 0x264   : > { %v1805_v16 = vpop.eup %1366  ;;  %v859_v51 = vsub.f32 %v1698_v60, %v801_v15  ;;  %1376 = vpow2.f32 %v900_v10 }
 0x265   : > { %v894_v18 = vmul.f32 1.442695, %v858_v50  ;;  %954 = vadd.xlane.f32.xlu0 %v1805_v16  ;;  %v1809_v23 = vpop.eup %1368 }
 0x266   : > { %v896_v53 = vmul.f32 1.442695, %v859_v51  ;;  %v811_v21 = vpop.xlane.xlu0 %810 }
 0x267   : > { %1378 = vpow2.f32 %v894_v18  ;;  %v864_v56 = vsub.f32 %v1702_v62, %v811_v21  ;;  %v813_v24 = vpop.xlane.xlu1 %812 }
 0x268   : > { %v1812_v26 = vpop.eup %1370  ;;  %v865_v59 = vsub.f32 %v1706_v1, %v813_v24  ;;  %1380 = vpow2.f32 %v896_v53 }
 0x269   : > { %v906_v29 = vmul.f32 1.442695, %v864_v56  ;;  %956 = vadd.xlane.f32.xlu1 %v1812_v26  ;;  %950 = vadd.xlane.f32.xlu0 %v1809_v23  ;;  %v1818_v37 = vpop.eup %1372 }
 0x26a   : > { %v908_v60 = vmul.f32 1.442695, %v865_v59  ;;  %v807_v31 = vpop.xlane.xlu0 %806 }
 0x26b   : > { %1382 = vpow2.f32 %v906_v29  ;;  %v862_v32 = vsub.f32 %v1711_v3, %v807_v31  ;;  %v809_v34 = vpop.xlane.xlu1 %808 }
 0x26c   : > { %v863_v62 = vsub.f32 %v1714_v4, %v809_v34  ;;  %1384 = vpow2.f32 %v908_v60 }
 0x26d   : > { %v1821_v38 = vpop.eup %1374  ;;  %v902_v40 = vmul.f32 1.442695, %v862_v32  ;;  %952 = vadd.xlane.f32.xlu1 %v1818_v37 }
 0x26e   : > { %v904_v1 = vmul.f32 1.442695, %v863_v62  ;;  %962 = vadd.xlane.f32.xlu0 %v1821_v38  ;;  %v819_v41 = vpop.xlane.xlu0 %818  ;;  %v1826_v3 = vpop.eup %1376 }
 0x26f   : > { %1386 = vpow2.f32 %v902_v40  ;;  %v868_v47 = vsub.f32 %v1718_v6, %v819_v41  ;;  %v821_v58 = vpop.xlane.xlu1 %820 }
 0x270   : > { %v869_v49 = vsub.f32 %v1722_v9, %v821_v58  ;;  %1388 = vpow2.f32 %v904_v1 }
 0x271   : > { %v1829_v52 = vpop.eup %1378  ;;  %v914_v4 = vmul.f32 1.442695, %v868_v47  ;;  %964 = vadd.xlane.f32.xlu1 %v1826_v3 }
 0x272   : > { %v916_v54 = vmul.f32 1.442695, %v869_v49  ;;  %958 = vadd.xlane.f32.xlu0 %v1829_v52  ;;  %v815_v55 = vpop.xlane.xlu0 %814  ;;  %v1834_v6 = vpop.eup %1380 }
 0x273   : > { %1390 = vpow2.f32 %v914_v4  ;;  %v866_v57 = vsub.f32 %v1727_v11, %v815_v55  ;;  %v817_v61 = vpop.xlane.xlu1 %816 }
 0x274   : > { %v867_v63 = vsub.f32 %v1730_v12, %v817_v61  ;;  %1392 = vpow2.f32 %v916_v54 }
 0x275   : > { %v1837_v44 = vpop.eup %1382  ;;  %v910_v9 = vmul.f32 1.442695, %v866_v57  ;;  %960 = vadd.xlane.f32.xlu1 %v1834_v6 }
 0x276   : > { %v912_v0 = vmul.f32 1.442695, %v867_v63  ;;  %970 = vadd.xlane.f32.xlu0 %v1837_v44  ;;  %v827_v2 = vpop.xlane.xlu0 %826  ;;  %v1842_v11 = vpop.eup %1384 }
 0x277   : > { %1394 = vpow2.f32 %v910_v9  ;;  %v872_v5 = vsub.f32 %v1734_v14, %v827_v2  ;;  %v829_v7 = vpop.xlane.xlu1 %828 }
 0x278   : > { %v873_v46 = vsub.f32 %v1738_v17, %v829_v7  ;;  %1396 = vpow2.f32 %v912_v0 }
 0x279   : > { %v1845_v8 = vpop.eup %1386  ;;  %v922_v12 = vmul.f32 1.442695, %v872_v5  ;;  %972 = vadd.xlane.f32.xlu1 %v1842_v11 }
 0x27a   : > { %v924_v48 = vmul.f32 1.442695, %v873_v46  ;;  %966 = vadd.xlane.f32.xlu0 %v1845_v8  ;;  %v823_v10 = vpop.xlane.xlu0 %822  ;;  %v1850_v14 = vpop.eup %1388 }
 0x27b   : > { %1398 = vpow2.f32 %v922_v12  ;;  %v870_v13 = vsub.f32 %v1743_v19, %v823_v10  ;;  %v825_v50 = vpop.xlane.xlu1 %824 }
 0x27c   : > { %v871_v15 = vsub.f32 %v1746_v20, %v825_v50  ;;  %1400 = vpow2.f32 %v924_v48 }
 0x27d   : > { %v1853_v51 = vpop.eup %1390  ;;  %v918_v17 = vmul.f32 1.442695, %v870_v13  ;;  %968 = vadd.xlane.f32.xlu1 %v1850_v14 }
 0x27e   : > { %v920_v18 = vmul.f32 1.442695, %v871_v15  ;;  %978 = vadd.xlane.f32.xlu0 %v1853_v51  ;;  %v835_v53 = vpop.xlane.xlu0 %834  ;;  %v1858_v19 = vpop.eup %1392 }
 0x27f   : > { %1402 = vpow2.f32 %v918_v17  ;;  %v876_v21 = vsub.f32 %v1750_v22, %v835_v53  ;;  %v837_v56 = vpop.xlane.xlu1 %836 }
 0x280   : > { %v877_v24 = vsub.f32 %v1754_v25, %v837_v56  ;;  %1404 = vpow2.f32 %v920_v18 }
 0x281   : > { %v1861_v59 = vpop.eup %1394  ;;  %v930_v20 = vmul.f32 1.442695, %v876_v21  ;;  %980 = vadd.xlane.f32.xlu1 %v1858_v19 }
 0x282   : > { %v932_v29 = vmul.f32 1.442695, %v877_v24  ;;  %974 = vadd.xlane.f32.xlu0 %v1861_v59  ;;  %v831_v60 = vpop.xlane.xlu0 %830  ;;  %v1866_v22 = vpop.eup %1396 }
 0x283   : > { %1406 = vpow2.f32 %v930_v20  ;;  %v874_v31 = vsub.f32 %v1759_v27, %v831_v60  ;;  %v833_v32 = vpop.xlane.xlu1 %832 }
 0x284   : > { %v875_v34 = vsub.f32 %v1762_v28, %v833_v32  ;;  %1408 = vpow2.f32 %v932_v29 }
 0x285   : > { %v1869_v62 = vpop.eup %1398  ;;  %v926_v25 = vmul.f32 1.442695, %v874_v31  ;;  %976 = vadd.xlane.f32.xlu1 %v1866_v22 }
 0x286   : > { %v928_v40 = vmul.f32 1.442695, %v875_v34  ;;  %986 = vadd.xlane.f32.xlu0 %v1869_v62  ;;  %v843_v1 = vpop.xlane.xlu0 %842  ;;  %v1874_v27 = vpop.eup %1400 }
 0x287   : > { %1410 = vpow2.f32 %v926_v25  ;;  %v880_v41 = vsub.f32 %v1766_v30, %v843_v1  ;;  %v845_v47 = vpop.xlane.xlu1 %844 }
 0x288   : > { %v881_v58 = vsub.f32 %v1770_v33, %v845_v47  ;;  %1412 = vpow2.f32 %v928_v40 }
 0x289   : > { %v1877_v49 = vpop.eup %1402  ;;  %v938_v28 = vmul.f32 1.442695, %v880_v41  ;;  %988 = vadd.xlane.f32.xlu1 %v1874_v27 }
 0x28a   : > { %v940_v4 = vmul.f32 1.442695, %v881_v58  ;;  %982 = vadd.xlane.f32.xlu0 %v1877_v49  ;;  %v839_v54 = vpop.xlane.xlu0 %838  ;;  %v1882_v30 = vpop.eup %1404 }
 0x28b   : > { %1414 = vpow2.f32 %v938_v28  ;;  %v878_v55 = vsub.f32 %v1775_v35, %v839_v54  ;;  %v841_v57 = vpop.xlane.xlu1 %840 }
 0x28c   : > { %v879_v61 = vsub.f32 %v1778_v36, %v841_v57  ;;  %1416 = vpow2.f32 %v940_v4 }
 0x28d   : > { %v1885_v63 = vpop.eup %1406  ;;  %v934_v33 = vmul.f32 1.442695, %v878_v55  ;;  %984 = vadd.xlane.f32.xlu1 %v1882_v30 }
 0x28e   : > { %v936_v9 = vmul.f32 1.442695, %v879_v61  ;;  %994 = vadd.xlane.f32.xlu0 %v1885_v63  ;;  %v847_v0 = vpop.xlane.xlu0 %846  ;;  %v1890_v5 = vpop.eup %1408 }
 0x28f   : > { %1418 = vpow2.f32 %v934_v33  ;;  %v882_v2 = vsub.f32 %v1783_v39, %v847_v0 }
 0x290   : > { %v849_v35 = vpop.xlane.xlu1 %848  ;;  %1420 = vpow2.f32 %v936_v9 }
 0x291   : > { %v1892_v7 = vpop.eup %1410  ;;  %v942_v46 = vmul.f32 1.442695, %v882_v2  ;;  %v883_v36 = vsub.f32 %v1786_v42, %v849_v35  ;;  %996 = vadd.xlane.f32.xlu1 %v1890_v5 }
 0x292   : > { %990 = vadd.xlane.f32.xlu0 %v1892_v7  ;;  %v851_v12 = vpop.xlane.xlu0 %850  ;;  %v1898_v13 = vpop.eup %1412 }
 0x293   : > { %1422 = vpow2.f32 %v942_v46  ;;  %v944_v48 = vmul.f32 1.442695, %v883_v36  ;;  %v884_v10 = vsub.f32 %v1790_v43, %v851_v12 }
 0x294   : > { %v853_v39 = vpop.xlane.xlu1 %852 }
 0x295   : > { %v1900_v50 = vpop.eup %1414  ;;  %1424 = vpow2.f32 %v944_v48  ;;  %v946_v15 = vmul.f32 1.442695, %v884_v10  ;;  %v885_v17 = vsub.f32 %v1794_v45, %v853_v39  ;;  %992 = vadd.xlane.f32.xlu1 %v1898_v13 }
 0x296   : > { %1002 = vadd.xlane.f32.xlu0 %v1900_v50  ;;  %v1905_v18 = vpop.eup %1416 }
 0x297   : > { %1426 = vpow2.f32 %v946_v15  ;;  %v948_v42 = vmul.f32 1.442695, %v885_v17 }
 0x299   : > { %v1907_v53 = vpop.eup %1418  ;;  %1428 = vpow2.f32 %v948_v42  ;;  %1004 = vadd.xlane.f32.xlu1 %v1905_v18 }
 0x29a   : > { %998 = vadd.xlane.f32.xlu0 %v1907_v53  ;;  %v1911_v43 = vpop.eup %1420 }
 0x29d   : > { %v1913_v21 = vpop.eup %1422  ;;  %1000 = vadd.xlane.f32.xlu1 %v1911_v43 }
 0x29e   : > { %1006 = vadd.xlane.f32.xlu0 %v1913_v21 }
 0x29f   : > { %v1917_v45 = vpop.eup %1424 }
 0x2a1   : > { %v1919_v56 = vpop.eup %1426  ;;  %1008 = vadd.xlane.f32.xlu1 %v1917_v45 }
 0x2a2   : > { %1010 = vadd.xlane.f32.xlu0 %v1919_v56 }
 0x2a3   : > { %v1923_v24 = vpop.eup %1428 }
 0x2a5   : > { %1012 = vadd.xlane.f32.xlu1 %v1923_v24 }
 0x2f2   : > { %v955_v20 = vpop.xlane.xlu0 %954 }
 0x2f3   : > { %1430 = vrcp.f32 %v955_v20 }
 0x2f6   : > { %v957_v29 = vpop.xlane.xlu1 %956  ;;  %v951_v60 = vpop.xlane.xlu0 %950 }
 0x2f7   : > { %1432 = vrcp.f32 %v957_v29 }
 0x2f8   : > { %1434 = vrcp.f32 %v951_v60 }
 0x2fa   : > { %v953_v31 = vpop.xlane.xlu1 %952 }
 0x2fb   : > { %1436 = vrcp.f32 %v953_v31  ;;  %v963_v32 = vpop.xlane.xlu0 %962 }
 0x2fc   : > { %1438 = vrcp.f32 %v963_v32 }
 0x2fd   : > { %v1431_v34 = vpop.eup %1430 }
 0x2fe   : > { %v1019_v25 = vmul.f32 %v1431_v34, %v1805_v16  ;;  %v965_v40 = vpop.xlane.xlu1 %964 }
 0x2ff   : > { %1440 = vrcp.f32 %v965_v40  ;;  %v959_v1 = vpop.xlane.xlu0 %958 }
 0x300   : > { %1081 = vst.msk [vmem:[%s1931_s28 + $0x10] sm:$0xff] %vm1078_vm1, %v1019_v25  ;;  %1442 = vrcp.f32 %v959_v1 }
 0x301   : > { %v1433_v41 = vpop.eup %1432 }
 0x302   : > { %v1435_v47 = vpop.eup %1434  ;;  %v1021_v58 = vmul.f32 %v1433_v41, %v1812_v26  ;;  %v961_v28 = vpop.xlane.xlu1 %960 }
 0x303   : > { %v1015_v4 = vmul.f32 %v1435_v47, %v1809_v23  ;;  %1444 = vrcp.f32 %v961_v28  ;;  %v971_v54 = vpop.xlane.xlu0 %970 }
 0x304   : > { %1082 = vst.msk [vmem:[%s1931_s28 + $0x18] sm:$0xff] %vm1078_vm1, %v1021_v58  ;;  %1446 = vrcp.f32 %v971_v54 }
 0x305   : > { %v1437_v16 = vpop.eup %1436  ;;  %1079 = vst.msk [vmem:[%s1931_s28] sm:$0xff] %vm1078_vm1, %v1015_v4 }
 0x306   : > { %v1439_v55 = vpop.eup %1438  ;;  %v1017_v57 = vmul.f32 %v1437_v16, %v1818_v37  ;;  %v973_v61 = vpop.xlane.xlu1 %972 }
 0x307   : > { %v1027_v33 = vmul.f32 %v1439_v55, %v1821_v38  ;;  %1448 = vrcp.f32 %v973_v61  ;;  %v967_v26 = vpop.xlane.xlu0 %966 }
 0x308   : > { %1080 = vst.msk [vmem:[%s1931_s28 + $0x8] sm:$0xff] %vm1078_vm1, %v1017_v57  ;;  %1450 = vrcp.f32 %v967_v26 }
 0x309   : > { %v1441_v23 = vpop.eup %1440  ;;  %1085 = vst.msk [vmem:[%s1931_s28 + $0x30] sm:$0xff] %vm1078_vm1, %v1027_v33 }
 0x30a   : > { %v1443_v9 = vpop.eup %1442  ;;  %v1029_v0 = vmul.f32 %v1441_v23, %v1826_v3  ;;  %v969_v2 = vpop.xlane.xlu1 %968 }
 0x30b   : > { %v1023_v35 = vmul.f32 %v1443_v9, %v1829_v52  ;;  %1452 = vrcp.f32 %v969_v2  ;;  %v979_v37 = vpop.xlane.xlu0 %978 }
 0x30c   : > { %1086 = vst.msk [vmem:[%s1931_s28 + $0x38] sm:$0xff] %vm1078_vm1, %v1029_v0  ;;  %1454 = vrcp.f32 %v979_v37 }
 0x30d   : > { %v1445_v38 = vpop.eup %1444  ;;  %1083 = vst.msk [vmem:[%s1931_s28 + $0x20] sm:$0xff] %vm1078_vm1, %v1023_v35 }
 0x30e   : > { %v1447_v46 = vpop.eup %1446  ;;  %v1025_v36 = vmul.f32 %v1445_v38, %v1834_v6  ;;  %v981_v12 = vpop.xlane.xlu1 %980 }
 0x30f   : > { %v1035_v48 = vmul.f32 %v1447_v46, %v1837_v44  ;;  %1456 = vrcp.f32 %v981_v12  ;;  %v975_v3 = vpop.xlane.xlu0 %974 }
 0x310   : > { %1084 = vst.msk [vmem:[%s1931_s28 + $0x28] sm:$0xff] %vm1078_vm1, %v1025_v36  ;;  %1458 = vrcp.f32 %v975_v3 }
 0x311   : > { %v1449_v52 = vpop.eup %1448  ;;  %1089 = vst.msk [vmem:[%s1931_s28 + $0x50] sm:$0xff] %vm1078_vm1, %v1035_v48 }
 0x312   : > { %v1451_v10 = vpop.eup %1450  ;;  %v1037_v39 = vmul.f32 %v1449_v52, %v1842_v11  ;;  %v977_v15 = vpop.xlane.xlu1 %976 }
 0x313   : > { %v1031_v17 = vmul.f32 %v1451_v10, %v1845_v8  ;;  %1460 = vrcp.f32 %v977_v15  ;;  %v987_v6 = vpop.xlane.xlu0 %986 }
 0x314   : > { %1090 = vst.msk [vmem:[%s1931_s28 + $0x58] sm:$0xff] %vm1078_vm1, %v1037_v39  ;;  %1462 = vrcp.f32 %v987_v6 }
 0x315   : > { %v1453_v44 = vpop.eup %1452  ;;  %1087 = vst.msk [vmem:[%s1931_s28 + $0x40] sm:$0xff] %vm1078_vm1, %v1031_v17 }
 0x316   : > { %v1455_v42 = vpop.eup %1454  ;;  %v1033_v20 = vmul.f32 %v1453_v44, %v1850_v14  ;;  %v989_v29 = vpop.xlane.xlu1 %988 }
 0x317   : > { %v1043_v60 = vmul.f32 %v1455_v42, %v1853_v51  ;;  %1464 = vrcp.f32 %v989_v29  ;;  %v983_v11 = vpop.xlane.xlu0 %982 }
 0x318   : > { %1088 = vst.msk [vmem:[%s1931_s28 + $0x48] sm:$0xff] %vm1078_vm1, %v1033_v20  ;;  %1466 = vrcp.f32 %v983_v11 }
 0x319   : > { %v1457_v8 = vpop.eup %1456  ;;  %1093 = vst.msk [vmem:[%s1931_s28 + $0x70] sm:$0xff] %vm1078_vm1, %v1043_v60 }
 0x31a   : > { %v1459_v31 = vpop.eup %1458  ;;  %v1045_v32 = vmul.f32 %v1457_v8, %v1858_v19  ;;  %v985_v34 = vpop.xlane.xlu1 %984 }
 0x31b   : > { %v1039_v25 = vmul.f32 %v1459_v31, %v1861_v59  ;;  %1468 = vrcp.f32 %v985_v34  ;;  %v995_v14 = vpop.xlane.xlu0 %994 }
 0x31c   : > { %1094 = vst.msk [vmem:[%s1931_s28 + $0x78] sm:$0xff] %vm1078_vm1, %v1045_v32  ;;  %1470 = vrcp.f32 %v995_v14 }
 0x31d   : > { %v1461_v51 = vpop.eup %1460  ;;  %1091 = vst.msk [vmem:[%s1931_s28 + $0x60] sm:$0xff] %vm1078_vm1, %v1039_v25 }
 0x31e   : > { %v1463_v40 = vpop.eup %1462  ;;  %v1041_v1 = vmul.f32 %v1461_v51, %v1866_v22  ;;  %v997_v41 = vpop.xlane.xlu1 %996 }
 0x31f   : > { %v1051_v47 = vmul.f32 %v1463_v40, %v1869_v62  ;;  %1472 = vrcp.f32 %v997_v41  ;;  %v991_v19 = vpop.xlane.xlu0 %990 }
 0x320   : > { %1092 = vst.msk [vmem:[%s1931_s28 + $0x68] sm:$0xff] %vm1078_vm1, %v1041_v1  ;;  %1474 = vrcp.f32 %v991_v19 }
 0x321   : > { %v1465_v59 = vpop.eup %1464  ;;  %1097 = vst.msk [vmem:[%s1931_s28 + $0x90] sm:$0xff] %vm1078_vm1, %v1051_v47 }
 0x322   : > { %v1467_v58 = vpop.eup %1466  ;;  %v1053_v28 = vmul.f32 %v1465_v59, %v1874_v27  ;;  %v993_v4 = vpop.xlane.xlu1 %992 }
 0x323   : > { %v1047_v54 = vmul.f32 %v1467_v58, %v1877_v49  ;;  %1476 = vrcp.f32 %v993_v4  ;;  %v1003_v22 = vpop.xlane.xlu0 %1002 }
 0x324   : > { %1098 = vst.msk [vmem:[%s1931_s28 + $0x98] sm:$0xff] %vm1078_vm1, %v1053_v28  ;;  %1478 = vrcp.f32 %v1003_v22 }
 0x325   : > { %v1469_v62 = vpop.eup %1468  ;;  %1095 = vst.msk [vmem:[%s1931_s28 + $0x80] sm:$0xff] %vm1078_vm1, %v1047_v54 }
 0x326   : > { %v1471_v16 = vpop.eup %1470  ;;  %v1049_v55 = vmul.f32 %v1469_v62, %v1882_v30  ;;  %v1005_v57 = vpop.xlane.xlu1 %1004 }
 0x327   : > { %v1059_v61 = vmul.f32 %v1471_v16, %v1885_v63  ;;  %1480 = vrcp.f32 %v1005_v57  ;;  %v999_v27 = vpop.xlane.xlu0 %998 }
 0x328   : > { %1096 = vst.msk [vmem:[%s1931_s28 + $0x88] sm:$0xff] %vm1078_vm1, %v1049_v55  ;;  %1482 = vrcp.f32 %v999_v27 }
 0x329   : > { %v1473_v49 = vpop.eup %1472  ;;  %1101 = vst.msk [vmem:[%s1931_s28 + $0xb0] sm:$0xff] %vm1078_vm1, %v1059_v61 }
 0x32a   : > { %v1475_v33 = vpop.eup %1474  ;;  %v1061_v26 = vmul.f32 %v1473_v49, %v1890_v5  ;;  %v1001_v23 = vpop.xlane.xlu1 %1000 }
 0x32b   : > { %v1055_v9 = vmul.f32 %v1475_v33, %v1892_v7  ;;  %1484 = vrcp.f32 %v1001_v23  ;;  %v1007_v30 = vpop.xlane.xlu0 %1006 }
 0x32c   : > { %1102 = vst.msk [vmem:[%s1931_s28 + $0xb8] sm:$0xff] %vm1078_vm1, %v1061_v26  ;;  %1486 = vrcp.f32 %v1007_v30 }
 0x32d   : > { %v1477_v63 = vpop.eup %1476  ;;  %1099 = vst.msk [vmem:[%s1931_s28 + $0xa0] sm:$0xff] %vm1078_vm1, %v1055_v9 }
 0x32e   : > { %v1479_v0 = vpop.eup %1478  ;;  %v1057_v2 = vmul.f32 %v1477_v63, %v1898_v13  ;;  %v1009_v35 = vpop.xlane.xlu1 %1008 }
 0x32f   : > { %v1067_v5 = vmul.f32 %v1479_v0, %v1900_v50  ;;  %1488 = vrcp.f32 %v1009_v35  ;;  %v1011_v37 = vpop.xlane.xlu0 %1010 }
 0x330   : > { %1100 = vst.msk [vmem:[%s1931_s28 + $0xa8] sm:$0xff] %vm1078_vm1, %v1057_v2  ;;  %1490 = vrcp.f32 %v1011_v37 }
 0x331   : > { %v1481_v7 = vpop.eup %1480  ;;  %1105 = vst.msk [vmem:[%s1931_s28 + $0xd0] sm:$0xff] %vm1078_vm1, %v1067_v5 }
 0x332   : > { %v1483_v38 = vpop.eup %1482  ;;  %v1069_v46 = vmul.f32 %v1481_v7, %v1905_v18  ;;  %v1013_v36 = vpop.xlane.xlu1 %1012 }
 0x333   : > { %v1063_v13 = vmul.f32 %v1483_v38, %v1907_v53  ;;  %1492 = vrcp.f32 %v1013_v36 }
 0x334   : > { %1106 = vst.msk [vmem:[%s1931_s28 + $0xd8] sm:$0xff] %vm1078_vm1, %v1069_v46 }
 0x335   : > { %v1485_v50 = vpop.eup %1484  ;;  %1103 = vst.msk [vmem:[%s1931_s28 + $0xc0] sm:$0xff] %vm1078_vm1, %v1063_v13 }
 0x336   : > { %v1487_v12 = vpop.eup %1486  ;;  %v1065_v48 = vmul.f32 %v1485_v50, %v1911_v43 }
 0x337   : > { %v1071_v3 = vmul.f32 %v1487_v12, %v1913_v21 }
 0x338   : > { %1104 = vst.msk [vmem:[%s1931_s28 + $0xc8] sm:$0xff] %vm1078_vm1, %v1065_v48 }
 0x339   : > { %v1489_v18 = vpop.eup %1488  ;;  %1107 = vst.msk [vmem:[%s1931_s28 + $0xe0] sm:$0xff] %vm1078_vm1, %v1071_v3 }
 0x33a   : > { %v1491_v52 = vpop.eup %1490  ;;  %v1073_v53 = vmul.f32 %v1489_v18, %v1917_v45 }
 0x33b   : > { %v1075_v10 = vmul.f32 %v1491_v52, %v1919_v56 }
 0x33c   : > { %1108 = vst.msk [vmem:[%s1931_s28 + $0xe8] sm:$0xff] %vm1078_vm1, %v1073_v53 }
 0x33d   : > { %v1493_v39 = vpop.eup %1492  ;;  %1109 = vst.msk [vmem:[%s1931_s28 + $0xf0] sm:$0xff] %vm1078_vm1, %v1075_v10 }
 0x33e   : > { %v1077_v15 = vmul.f32 %v1493_v39, %v1923_v24 }
 0x340   : > { %1110 = vst.msk [vmem:[%s1931_s28 + $0xf8] sm:$0xff] %vm1078_vm1, %v1077_v15 }
 0x341 PF: > { %s15_s18 = sadd.s32 1, %s1500_s18  }
 0x342   : > { %p12_p4 = scmp.ge.s32.totalorder %s15_s18, 4  }
 0x344   :  { %14 = sbr.rel (!%p12_p4) target bundleno = 1 (0x1), region = 70 }

</bundles_post_ra>
